<compile_context>
chip_gen: v7x
topology: tpu7x:2x2x1
jax: 0.10.0
libtpu: 0.0.40
codegen_flags: <defaults>
</compile_context>

<pallas_src>
import functools

import jax
import jax.numpy as jnp
from jax.experimental import pallas as pl
from jax.experimental.pallas import tpu as pltpu

LANE = 128
SUBLANE = 8
MAX_BLOCK_ROWS = 4096          # 4096 x 128 x f32 = 2 MiB per input tile


def _bce_blur_kernel(n_ref, pred_ref, true_ref, out_ref, *, alpha, block_rows):
    i = pl.program_id(0)
    n = n_ref[0]

    x = pred_ref[...].astype(jnp.float32)
    y = true_ref[...].astype(jnp.float32)

    # nn.BCEWithLogitsLoss(reduction='none'), numerically stable form:
    #   loss = max(x, 0) - x*y + log1p(exp(-|x|))
    e = jnp.exp(-jnp.abs(x))                       # shared transcendental
    loss = jnp.maximum(x, 0.0) - x * y + jnp.log1p(e)

    # sigmoid(x) derived from the same exp:
    #   x >= 0: 1/(1+e)   x < 0: e/(1+e)     (e = exp(-|x|))
    inv = 1.0 / (1.0 + e)
    p = jnp.where(x >= 0.0, inv, e * inv)

    dx = p - y
    alpha_factor = 1.0 - jnp.exp((dx - 1.0) / (alpha + 0.0001))
    loss = loss * alpha_factor

    block_elems = block_rows * LANE
    full = (i + 1) * block_elems <= n              # all lanes of this block valid?

    def _reduce(vals):
        # VPU-only partial reduce within the block: (block_rows,128) -> (8,128).
        return vals.reshape(block_rows // SUBLANE, SUBLANE, LANE).sum(axis=0)

    @pl.when(full)
    def _():
        out_ref[...] = _reduce(loss)

    @pl.when(jnp.logical_not(full))
    def _():
        # Ragged last block: zero invalid lanes (covers both the wrapper's
        # tiny zero pad and any unspecified values Pallas read past the end)
        # BEFORE the reduce so garbage/padding never leaks in.
        row = jax.lax.broadcasted_iota(jnp.int32, (block_rows, LANE), 0)
        lane = jax.lax.broadcasted_iota(jnp.int32, (block_rows, LANE), 1)
        gidx = (i * block_rows + row) * LANE + lane
        out_ref[...] = _reduce(jnp.where(gidx < n, loss, 0.0))


def bce_blur_with_logits_loss(pred, true, alpha=0.05):
    assert pred.shape == true.shape
    n = int(pred.size)

    # Flatten (no dtype upcast here; the kernel casts to f32 internally).
    flat_p = pred.reshape(-1)
    flat_t = true.reshape(-1)

    # Pad only the tiny tail so the slab is (rows, 128) with rows a multiple
    # of the (sub-32-bit aware) sublane packing. Skipped entirely when the
    # size is already aligned — no full-array copies.
    pack = max(1, 4 // jnp.dtype(pred.dtype).itemsize)     # f32:1, bf16:2, i8:4
    row_align = SUBLANE * pack
    chunk = row_align * LANE
    padded_n = pl.cdiv(n, chunk) * chunk
    if padded_n != n:
        flat_p = jnp.pad(flat_p, (0, padded_n - n))
        flat_t = jnp.pad(flat_t, (0, padded_n - n))
    rows = padded_n // LANE
    pred2d = flat_p.reshape(rows, LANE)
    true2d = flat_t.reshape(rows, LANE)

    block_rows = min(MAX_BLOCK_ROWS, rows)     # rows % row_align == 0 -> valid tile
    num_blocks = pl.cdiv(rows, block_rows)

    kernel = functools.partial(
        _bce_blur_kernel, alpha=float(alpha), block_rows=block_rows)
    n_arr = jnp.array([n], dtype=jnp.int32)

    partials = pl.pallas_call(
        kernel,
        out_shape=jax.ShapeDtypeStruct((num_blocks, SUBLANE, LANE), jnp.float32),
        grid_spec=pltpu.PrefetchScalarGridSpec(
            num_scalar_prefetch=1,
            grid=(num_blocks,),
            in_specs=[
                pl.BlockSpec((block_rows, LANE), lambda i, n_ref: (i, 0)),
                pl.BlockSpec((block_rows, LANE), lambda i, n_ref: (i, 0)),
            ],
            out_specs=pl.BlockSpec((None, SUBLANE, LANE),
                                   lambda i, n_ref: (i, 0, 0)),
        ),
        compiler_params=pltpu.CompilerParams(
            dimension_semantics=("parallel",)),
    )(n_arr, pred2d, true2d)

    # Tiny final reduce (num_blocks * 1024 floats) + mean.
    return jnp.sum(partials) / jnp.float32(n)


def _reference(pred, true, alpha=0.05):
    x = pred.astype(jnp.float32)
    y = true.astype(jnp.float32)
    loss = jnp.maximum(x, 0.0) - x * y + jnp.log1p(jnp.exp(-jnp.abs(x)))
    p = jax.nn.sigmoid(x)
    dx = p - y
    alpha_factor = 1.0 - jnp.exp((dx - 1.0) / (alpha + 0.0001))
    return jnp.mean(loss * alpha_factor)


if __name__ == "__main__":
    key = jax.random.PRNGKey(0)
    k1, k2, k3, k4 = jax.random.split(key, 4)

    # NCHW inputs, small shapes (aligned case: n = 2048, no padding path)
    pred = jax.random.normal(k1, (2, 4, 16, 16), dtype=jnp.float32)
    true = (jax.random.uniform(k2, (2, 4, 16, 16)) > 0.5).astype(jnp.float32)

    out = bce_blur_with_logits_loss(pred, true, alpha=0.05)
    out = jax.block_until_ready(out)
    ref = _reference(pred, true, alpha=0.05)
    assert jnp.allclose(out, ref, rtol=1e-4, atol=1e-6), (out, ref)

    # Ragged case (n = 210): exercises the in-kernel iota tail-mask branch.
    pred2 = jax.random.normal(k3, (2, 3, 5, 7), dtype=jnp.float32)
    true2 = (jax.random.uniform(k4, (2, 3, 5, 7)) > 0.5).astype(jnp.float32)
    out2 = jax.block_until_ready(bce_blur_with_logits_loss(pred2, true2, 0.05))
    ref2 = _reference(pred2, true2, 0.05)
    assert jnp.allclose(out2, ref2, rtol=1e-4, atol=1e-6), (out2, ref2)

    print("KERNEL_OK")
</pallas_src>

<mosaic_0001>
module attributes {stable_mosaic.version = 11 : i64} {
  func.func @_bce_blur_kernel(%arg0: i32, %arg1: memref<1xi32, #tpu.memory_space<smem>>, %arg2: memref<16x128xf32, #tpu.memory_space<vmem>>, %arg3: memref<16x128xf32, #tpu.memory_space<vmem>>, %arg4: memref<1x8x128xf32, #tpu.memory_space<vmem>>) attributes {dimension_semantics = [#tpu.dimension_semantics<parallel>], iteration_bounds = array<i64: 1>, scalar_prefetch = 1 : i64, scratch_operands = 0 : i64, tpu.core_type = #tpu.core_type<tc>, window_params = [{transform_indices = @transform_0, window_bounds = array<i64: 16, 128>}, {transform_indices = @transform_1, window_bounds = array<i64: 16, 128>}, {transform_indices = @transform_2, window_bounds = array<i64: 1, 8, 128>}]} {
    %c0 = arith.constant 0 : index
    %0 = memref.load %arg1[%c0] : memref<1xi32, #tpu.memory_space<smem>>
    %c0_0 = arith.constant 0 : index
    %c0_1 = arith.constant 0 : index
    %1 = vector.load %arg2[%c0_0, %c0_1] : memref<16x128xf32, #tpu.memory_space<vmem>>, vector<16x128xf32>
    %c0_2 = arith.constant 0 : index
    %c0_3 = arith.constant 0 : index
    %2 = vector.load %arg3[%c0_2, %c0_3] : memref<16x128xf32, #tpu.memory_space<vmem>>, vector<16x128xf32>
    %3 = math.absf %1 : vector<16x128xf32>
    %cst = arith.constant 0.000000e+00 : f32
    %4 = vector.broadcast %cst : f32 to vector<16x128xf32>
    %5 = arith.subf %4, %3 : vector<16x128xf32>
    %6 = math.exp %5 : vector<16x128xf32>
    %cst_4 = arith.constant 0.000000e+00 : f32
    %7 = vector.broadcast %cst_4 : f32 to vector<16x128xf32>
    %8 = arith.maximumf %1, %7 : vector<16x128xf32>
    %9 = arith.mulf %1, %2 : vector<16x128xf32>
    %10 = arith.subf %8, %9 : vector<16x128xf32>
    %11 = math.log1p %6 : vector<16x128xf32>
    %12 = arith.addf %10, %11 : vector<16x128xf32>
    %cst_5 = arith.constant 1.000000e+00 : f32
    %13 = vector.broadcast %cst_5 : f32 to vector<16x128xf32>
    %14 = arith.addf %13, %6 : vector<16x128xf32>
    %cst_6 = arith.constant 1.000000e+00 : f32
    %15 = vector.broadcast %cst_6 : f32 to vector<16x128xf32>
    %16 = arith.divf %15, %14 : vector<16x128xf32>
    %cst_7 = arith.constant 0.000000e+00 : f32
    %17 = vector.broadcast %cst_7 : f32 to vector<16x128xf32>
    %18 = arith.cmpf oge, %1, %17 : vector<16x128xf32>
    %19 = arith.mulf %6, %16 : vector<16x128xf32>
    %20 = arith.select %18, %16, %19 : vector<16x128xi1>, vector<16x128xf32>
    %21 = arith.subf %20, %2 : vector<16x128xf32>
    %cst_8 = arith.constant 1.000000e+00 : f32
    %22 = vector.broadcast %cst_8 : f32 to vector<16x128xf32>
    %23 = arith.subf %21, %22 : vector<16x128xf32>
    %cst_9 = arith.constant 5.010000e-02 : f32
    %24 = vector.broadcast %cst_9 : f32 to vector<16x128xf32>
    %25 = arith.divf %23, %24 : vector<16x128xf32>
    %26 = math.exp %25 : vector<16x128xf32>
    %cst_10 = arith.constant 1.000000e+00 : f32
    %27 = vector.broadcast %cst_10 : f32 to vector<16x128xf32>
    %28 = arith.subf %27, %26 : vector<16x128xf32>
    %29 = arith.mulf %12, %28 : vector<16x128xf32>
    %c1_i32 = arith.constant 1 : i32
    %30 = arith.addi %arg0, %c1_i32 : i32
    %c2048_i32 = arith.constant 2048 : i32
    %31 = arith.muli %30, %c2048_i32 : i32
    %32 = arith.cmpi sle, %31, %0 : i32
    %33 = arith.extui %32 : i1 to i32
    %c0_i32 = arith.constant 0 : i32
    %34 = arith.cmpi ne, %33, %c0_i32 : i32
    scf.if %34 {
      %38 = vector.shape_cast %29 : vector<16x128xf32> to vector<2x8x128xf32>
      %cst_12 = arith.constant dense<0.000000e+00> : vector<8x128xf32>
      %39 = vector.multi_reduction <add>, %38, %cst_12 [0] : vector<2x8x128xf32> to vector<8x128xf32>
      %c0_13 = arith.constant 0 : index
      %c0_14 = arith.constant 0 : index
      %c0_15 = arith.constant 0 : index
      %40 = vector.load %arg4[%c0_13, %c0_14, %c0_15] : memref<1x8x128xf32, #tpu.memory_space<vmem>>, vector<1x8x128xf32>
      %41 = vector.shape_cast %40 : vector<1x8x128xf32> to vector<8x128xf32>
      %42 = vector.shape_cast %39 : vector<8x128xf32> to vector<1x8x128xf32>
      tpu.vector_store %arg4[%c0_13, %c0_14, %c0_15], %42 {strides = array<i32>} : memref<1x8x128xf32, #tpu.memory_space<vmem>>, vector<1x8x128xf32>,
    } else {
    }
    %true = arith.constant true
    %35 = arith.xori %32, %true : i1
    %36 = arith.extui %35 : i1 to i32
    %c0_i32_11 = arith.constant 0 : i32
    %37 = arith.cmpi ne, %36, %c0_i32_11 : i32
    scf.if %37 {
      %38 = tpu.iota {dimensions = array<i32: 0>} : vector<16x128xi32>
      %39 = tpu.iota {dimensions = array<i32: 1>} : vector<16x128xi32>
      %c16_i32 = arith.constant 16 : i32
      %40 = arith.muli %arg0, %c16_i32 : i32
      %41 = vector.broadcast %40 : i32 to vector<16x128xi32>
      %42 = arith.addi %41, %38 : vector<16x128xi32>
      %c128_i32 = arith.constant 128 : i32
      %43 = vector.broadcast %c128_i32 : i32 to vector<16x128xi32>
      %44 = arith.muli %42, %43 : vector<16x128xi32>
      %45 = arith.addi %44, %39 : vector<16x128xi32>
      %46 = vector.broadcast %0 : i32 to vector<16x128xi32>
      %47 = arith.cmpi slt, %45, %46 : vector<16x128xi32>
      %cst_12 = arith.constant 0.000000e+00 : f32
      %48 = vector.broadcast %cst_12 : f32 to vector<16x128xf32>
      %49 = arith.select %47, %29, %48 : vector<16x128xi1>, vector<16x128xf32>
      %50 = vector.shape_cast %49 : vector<16x128xf32> to vector<2x8x128xf32>
      %cst_13 = arith.constant dense<0.000000e+00> : vector<8x128xf32>
      %51 = vector.multi_reduction <add>, %50, %cst_13 [0] : vector<2x8x128xf32> to vector<8x128xf32>
      %c0_14 = arith.constant 0 : index
      %c0_15 = arith.constant 0 : index
      %c0_16 = arith.constant 0 : index
      %52 = vector.load %arg4[%c0_14, %c0_15, %c0_16] : memref<1x8x128xf32, #tpu.memory_space<vmem>>, vector<1x8x128xf32>
      %53 = vector.shape_cast %52 : vector<1x8x128xf32> to vector<8x128xf32>
      %54 = vector.shape_cast %51 : vector<8x128xf32> to vector<1x8x128xf32>
      tpu.vector_store %arg4[%c0_14, %c0_15, %c0_16], %54 {strides = array<i32>} : memref<1x8x128xf32, #tpu.memory_space<vmem>>, vector<1x8x128xf32>,
    } else {
    }
    return
  }
  func.func @transform_0(%arg0: i32, %arg1: memref<1xi32, #tpu.memory_space<smem>>) -> (i32, i32) {
    %c0_i32 = arith.constant 0 : i32
    %c0_i32_0 = arith.constant 0 : i32
    return %arg0, %c0_i32 : i32, i32
  }
  func.func @transform_1(%arg0: i32, %arg1: memref<1xi32, #tpu.memory_space<smem>>) -> (i32, i32) {
    %c0_i32 = arith.constant 0 : i32
    %c0_i32_0 = arith.constant 0 : i32
    return %arg0, %c0_i32 : i32, i32
  }
  func.func @transform_2(%arg0: i32, %arg1: memref<1xi32, #tpu.memory_space<smem>>) -> (i32, i32, i32) {
    %c0_i32 = arith.constant 0 : i32
    %c0_i32_0 = arith.constant 0 : i32
    %c0_i32_1 = arith.constant 0 : i32
    return %arg0, %c0_i32, %c0_i32_0 : i32, i32, i32
  }
}

</mosaic_0001>

<bundles_post_ra>
// kernel: tpu_custom_call.1
= control target key start
LH: loop header
LB: loop body
LE: loop exit
PB: predicated region body
PF: predicated region fallthrough
CT: control target
= control target key end

     0   :  { %9 = vsyncpa [#allocation5], 0  ;;  %s325_s0 = inlined_call_operand.<no memory space> [shape: s32[1], index: 0, kind: input, shape index: {}]   ;;  %s326_s1 = inlined_call_operand.hbm [shape: f32[16,128], index: 1, kind: input, shape index: {}]   ;;  %s327_s2 = inlined_call_operand.hbm [shape: f32[16,128], index: 2, kind: input, shape index: {}]   ;;  %s328_s3 = inlined_call_operand.hbm [shape: f32[1,8,128], index: 3, kind: output, shape index: {}]  }
   0x1   :  { %10 = vsyncpa [#allocation8], 0 }
   0x2   :  { %11 = vsyncpa [#allocation6], 0  ;;  %s255_s12 = smov [#allocation4]   ;;  %s183_s16 = scalar_lea.hbm %s326_s1, 256 }
   0x3   :  { %s17_s13 = sshll.u32 %s255_s12, 4  ;;  %p184_p0 = scmp.ne.s32.totalorder %s326_s1, %s183_s16  ;;  %s18_s13 = int_to_ptr.vmem [resolvable:$true] %s17_s13 }
   0x4   :  { %p187_p1 = scmp.lt.u32.totalorder %s183_s16, %s326_s1 }
   0x6   :  { %p189_p2 = pnand %p187_p1, %p184_p0 }
   0x8   :  { %192 = shalt.err (!%p189_p2)
}
   0x9   :  { %s193_s21 = scalar_lea.vmem %s18_s13, 256  ;;  %p198_p4 = scmp.lt.s32.totalorder %s18_s13, %s18_s13 }
   0xa   :  { %p194_p3 = scmp.ne.s32.totalorder %s18_s13, %s193_s21  ;;  %p199_p5 = scmp.lt.s32.totalorder %s193_s21, %s193_s21 }
   0xc   :  { %p200_p6 = por %p199_p5, %p198_p4 }
   0xe   :  { %p201_p7 = pnand %p200_p6, %p194_p3 }
  0x10   :  { %204 = shalt.err (!%p201_p7)
}
  0x11   :  { %s256_s22 = smov 128   ;;  %s257_s23 = smov 8  }
  0x12   :  { %23 = dma.hbm_to_vmem [thread:$0]  %s326_s1, 256, %s18_s13, [#allocation5], %s256_s22, %s256_s22, %s257_s23  }
  0x13   :  { %s258_s26 = smov [#allocation7]   ;;  %s205_s30 = scalar_lea.hbm %s327_s2, 256 }
  0x14   :  { %s29_s27 = sshll.u32 %s258_s26, 4  ;;  %p206_p8 = scmp.ne.s32.totalorder %s327_s2, %s205_s30  ;;  %s30_s27 = int_to_ptr.vmem [resolvable:$true] %s29_s27 }
  0x15   :  { %p209_p9 = scmp.lt.u32.totalorder %s205_s30, %s327_s2 }
  0x17   :  { %p211_p10 = pnand %p209_p9, %p206_p8 }
  0x19   :  { %214 = shalt.err (!%p211_p10)
}
  0x1a   :  { %s215_s8 = scalar_lea.vmem %s30_s27, 256  ;;  %p220_p12 = scmp.lt.s32.totalorder %s30_s27, %s30_s27 }
  0x1b   :  { %p216_p11 = scmp.ne.s32.totalorder %s30_s27, %s215_s8  ;;  %p221_p13 = scmp.lt.s32.totalorder %s215_s8, %s215_s8 }
  0x1d   :  { %p222_p0 = por %p221_p13, %p220_p12 }
  0x1f   :  { %p223_p1 = pnand %p222_p0, %p216_p11 }
  0x21   :  { %226 = shalt.err (!%p223_p1)
}
  0x22   :  { %35 = dma.hbm_to_vmem [thread:$0]  %s327_s2, 256, %s30_s27, [#allocation8], %s256_s22, %s256_s22, %s257_s23  }
  0x23   :  { %249 = dma.done.wait [#allocation5], 256  }
  0x24   :  { %250 = vsyncadd [#allocation5], 4294967040 }
  0x25   :  { %251 = dma.done.wait [#allocation8], 256  }
  0x26   :  { %252 = vsyncadd [#allocation8], 4294967040  ;;  %v43_v0 = vld [vmem:[#allocation4] sm:$0xff]  ;;  %v44_v1 = vld [vmem:[#allocation4 + $0x8] sm:$0xff]  ;;  %p159_p2 = scmp.lt.s32.totalorder %s325_s0, 2048 }
  0x27   :  { %v47_v2 = vand.u32 2147483647, %v43_v0  ;;  %v48_v3 = vand.u32 2147483647, %v44_v1  ;;  %vm87_vm0 = vcmp.ge.f32.partialorder %v43_v0, 0.0  ;;  %v45_v14 = vld [vmem:[#allocation7] sm:$0xff] }
  0x28   :  { %vm88_vm1 = vcmp.ge.f32.partialorder %v44_v1, 0.0  ;;  %v46_v16 = vld [vmem:[#allocation7 + $0x8] sm:$0xff]  ;;  %v55_v36 = vmax.f32 %v43_v0, 0.0  ;;  %v57_v37 = vmul.f32 %v45_v14, %v43_v0  ;;  %v56_v38 = vmax.f32 %v44_v1, 0.0 }
  0x29   :  { %v49_v4 = vsub.f32 0.0, %v47_v2  ;;  %v50_v5 = vsub.f32 0.0, %v48_v3  ;;  %v58_v39 = vmul.f32 %v46_v16, %v44_v1 }
  0x2a   :  { %v59_v44 = vsub.f32 %v55_v36, %v57_v37 }
  0x2b   :  { %v51_v6 = vmul.f32 1.442695, %v49_v4  ;;  %v53_v7 = vmul.f32 1.442695, %v50_v5  ;;  %v60_v45 = vsub.f32 %v56_v38, %v58_v39 }
  0x2d   :  { %167 = vpow2.f32 %v51_v6 }
  0x2e   :  { %169 = vpow2.f32 %v53_v7 }
  0x37   :  { %v168_v8 = vpop.eup %167 }
  0x38   :  { %v170_v9 = vpop.eup %169  ;;  %v61_v10 = vadd.f32 1.0, %v168_v8  ;;  %v64_v22 = vmul.f32 -0.5, %v168_v8  ;;  %v67_v31 = vand.u32 2147483647, %v168_v8 }
  0x39   :  { %v70_v11 = vadd.f32 1.0, %v170_v9  ;;  %v73_v24 = vmul.f32 -0.5, %v170_v9  ;;  %v76_v35 = vand.u32 2147483647, %v170_v9 }
  0x3a   :  { %171 = vrcp.f32 %v61_v10  ;;  %v65_v28 = vadd.f32 1.0, %v64_v22  ;;  %vm68_vm2 = vcmp.lt.f32.partialorder %v67_v31, 0.0004427343 }
  0x3b   :  { %173 = vrcp.f32 %v70_v11  ;;  %v74_v32 = vadd.f32 1.0, %v73_v24  ;;  %vm77_vm3 = vcmp.lt.f32.partialorder %v76_v35, 0.0004427343 }
  0x3c   :  { %175 = vlog2.f32 %v61_v10  ;;  %v66_v41 = vmul.f32 %v168_v8, %v65_v28 }
  0x3d   :  { %177 = vlog2.f32 %v70_v11  ;;  %v75_v43 = vmul.f32 %v170_v9, %v74_v32 }
  0x44   :  { %v172_v12 = vpop.eup %171 }
  0x45   :  { %v174_v13 = vpop.eup %173  ;;  %v89_v15 = vmul.f32 %v172_v12, %v168_v8 }
  0x46   :  { %v90_v17 = vmul.f32 %v174_v13, %v170_v9  ;;  %v176_v30 = vpop.eup %175 }
  0x47   :  { %v91_v18 = vsel %vm87_vm0, %v172_v12, %v89_v15  ;;  %v178_v34 = vpop.eup %177  ;;  %v63_v40 = vmul.f32 0.6931472, %v176_v30 }
  0x48   :  { %v92_v19 = vsel %vm88_vm1, %v174_v13, %v90_v17  ;;  %v93_v20 = vsub.f32 %v91_v18, %v45_v14  ;;  %v72_v42 = vmul.f32 0.6931472, %v178_v34 }
  0x49   :  { %v94_v21 = vsub.f32 %v92_v19, %v46_v16  ;;  %v69_v46 = vsel %vm68_vm2, %v66_v41, %v63_v40 }
  0x4a   :  { %v156_v23 = vadd.f32 -1.0, %v93_v20  ;;  %v78_v47 = vsel %vm77_vm3, %v75_v43, %v72_v42  ;;  %v79_v48 = vadd.f32 %v69_v46, %v59_v44 }
  0x4b   :  { %v157_v25 = vadd.f32 -1.0, %v94_v21  ;;  %v80_v50 = vadd.f32 %v78_v47, %v60_v45 }
  0x4c   :  { %v98_v26 = vmul.f32 19.960081, %v156_v23 }
  0x4d   :  { %v99_v27 = vmul.f32 19.960081, %v157_v25 }
  0x4e   :  { %v100_v29 = vmul.f32 1.442695, %v98_v26 }
  0x4f   :  { %v102_v33 = vmul.f32 1.442695, %v99_v27 }
  0x50   :  { %179 = vpow2.f32 %v100_v29 }
  0x51   :  { %181 = vpow2.f32 %v102_v33 }
  0x58   :  { %113 = sbr.rel (%p159_p2) target bundleno = 99 (0x63), region = 21 }
  0x5a   :  { %v180_v49 = vpop.eup %179 }
  0x5b   :  { %v182_v51 = vpop.eup %181  ;;  %v104_v52 = vsub.f32 1.0, %v180_v49 }
  0x5c   :  { %v105_v53 = vsub.f32 1.0, %v182_v51 }
  0x5d   :  { %v106_v54 = vmul.f32 %v104_v52, %v79_v48 }
  0x5e   :  { %v107_v55 = vmul.f32 %v105_v53, %v80_v50 }
  0x60   :  { %v114_v56 = vadd.f32 %v107_v55, %v106_v54 }
  0x62   :  { %115 = vst [vmem:[#allocation9] sm:$0xff] %v114_v56 }
  0x63 PF:  { %p161_p3 = scmp.ge.s32.totalorder %s325_s0, 2048 }
  0x64   :  { %v120_v57 = vlaneseq (!%p161_p3)  ;;  %v133_v62 = vstv (!%p161_p3), %s325_s0 }
  0x65   :  { %119 = sbr.rel (%p161_p3) target bundleno = 115 (0x73), region = 25 }
  0x66   :  { %v121_v58 = vshrl.u32 (!%p161_p3), %v120_v57, 7  ;;  %v124_v59 = vand.u32 (!%p161_p3), 127, %v120_v57 }
  0x68   :  { %v122_v60 = vadd.s32 (!%p161_p3), 8, %v121_v58  ;;  %v129_v61 = vmul.u32 (!%p161_p3), 128, %v121_v58 }
  0x6a   :  { %v130_v63 = vmul.u32 (!%p161_p3), 128, %v122_v60  ;;  %v131_v0 = vadd.s32 (!%p161_p3), %v129_v61, %v124_v59 }
  0x6c   :  { %v132_v1 = vadd.s32 %v130_v63, %v124_v59  ;;  %vm134_vm4 = vcmp.lt.s32.totalorder %v131_v0, %v133_v62 }
  0x6d   :  { %v136_v2 = vsel %vm134_vm4, %v106_v54, 0.0 }
  0x6e   :  { %vm135_vm5 = vcmp.lt.s32.totalorder %v132_v1, %v133_v62 }
  0x6f   :  { %v137_v3 = vsel %vm135_vm5, %v107_v55, 0.0 }
  0x70   :  { %v138_v4 = vadd.f32 %v137_v3, %v136_v2 }
  0x72   :  { %139 = vst [vmem:[#allocation9] sm:$0xff] %v138_v4 }
  0x73 PF:  { %s259_s15 = smov [#allocation9]  }
  0x74   :  { %s146_s16 = sshll.u32 %s259_s15, 4  ;;  %s147_s16 = int_to_ptr.vmem [resolvable:$true] %s146_s16 }
  0x75   :  { %s227_s17 = scalar_lea.vmem %s147_s16, 128  ;;  %p232_p5 = scmp.lt.s32.totalorder %s147_s16, %s147_s16 }
  0x76   :  { %p228_p4 = scmp.ne.s32.totalorder %s147_s16, %s227_s17  ;;  %p233_p6 = scmp.lt.s32.totalorder %s227_s17, %s227_s17 }
  0x78   :  { %p234_p7 = por %p233_p6, %p232_p5 }
  0x7a   :  { %p235_p8 = pnand %p234_p7, %p228_p4 }
  0x7c   :  { %238 = shalt.err (!%p235_p8)
}
  0x7d   :  { %s239_s19 = scalar_lea.hbm %s328_s3, 128 }
  0x7e   :  { %p240_p9 = scmp.ne.s32.totalorder %s328_s3, %s239_s19  ;;  %p243_p10 = scmp.lt.u32.totalorder %s239_s19, %s328_s3 }
  0x80   :  { %p245_p11 = pnand %p243_p10, %p240_p9 }
  0x82   :  { %248 = shalt.err (!%p245_p11)
}
  0x83   :  { %149 = dma.vmem_to_hbm [thread:$0]  %s147_s16, 128, %s328_s3, [#allocation6]  }
  0x84   :  { %253 = dma.done.wait [#allocation6], 128  }
  0x85   :  { %254 = vsyncadd [#allocation6], 4294967168 }
  0x86   :  { %153 = vsyncpa [#allocation5], 1 }
  0x87   :  { %154 = vsyncpa [#allocation8], 1 }
  0x88   :  { %155 = vsyncpa [#allocation6], 1 }

</bundles_post_ra>
